<compile_context>
chip_gen: v6e
topology: v6e:2x2x1
jax: 0.10.0
libtpu: 0.0.40
codegen_flags: <defaults>
</compile_context>

<pallas_src>
import functools

import jax
import jax.numpy as jnp
from jax.experimental import pallas as pl
from jax.experimental.pallas import tpu as pltpu

LANE = 128      # last-dim alignment (vreg lane width)
SUBLANE = 8     # second-to-last-dim alignment (f32 sublanes)


def _round_up(x: int, m: int) -> int:
    return (x + m - 1) // m * m


# ---------------------------------------------------------------------------
# Fused kernel: x -> [Linear -> ReLU -> Dropout(eval)]* -> features -> Linear -> out
# ---------------------------------------------------------------------------
def _mlp_fused_kernel(*refs, num_layers: int):
    """refs = (x, w0, b0, ..., w_{L-1}, b_{L-1}, out, features); all VMEM tiles.

    x:   [Mt, D0p]          (padded, lane-dense)
    w_i: [Dip, D(i+1)p]     (padded, fully resident)
    b_i: [1,  D(i+1)p]
    out: [Mt, Doutp], features: [Mt, Dfeatp]
    """
    x_ref = refs[0]
    wb = refs[1:1 + 2 * num_layers]
    out_ref = refs[1 + 2 * num_layers]
    feat_ref = refs[2 + 2 * num_layers]

    h = x_ref[...].astype(jnp.float32)
    # Hidden layers: Linear -> ReLU -> Dropout(eval: identity). Unrolled at trace time;
    # intermediates stay in VMEM/vregs (never round-trip HBM).
    for i in range(num_layers - 1):
        w = wb[2 * i][...]
        b = wb[2 * i + 1][...]
        h = jnp.dot(h, w, preferred_element_type=jnp.float32) + b
        h = jnp.maximum(h, 0.0)

    feat_ref[...] = h.astype(feat_ref.dtype)

    # Final head: plain Linear.
    w_last = wb[-2][...]
    b_last = wb[-1][...]
    out = jnp.dot(h, w_last, preferred_element_type=jnp.float32) + b_last
    out_ref[...] = out.astype(out_ref.dtype)


# ---------------------------------------------------------------------------
# Parameter init / padding
# ---------------------------------------------------------------------------
def init_mlp_params(key, input_dim, hidden_dims, out_dim, dtype=jnp.float32):
    """Deterministic init mimicking nn.Linear (uniform in +/- 1/sqrt(fan_in)).

    Weights stored as [in_dim, out_dim] (transposed vs. PyTorch's [out, in])."""
    dims = [input_dim] + list(hidden_dims) + [out_dim]
    params = []
    for i in range(len(dims) - 1):
        fan_in, fan_out = dims[i], dims[i + 1]
        key, kw, kb = jax.random.split(key, 3)
        bound = 1.0 / jnp.sqrt(jnp.asarray(fan_in, dtype))
        w = jax.random.uniform(kw, (fan_in, fan_out), dtype, -bound, bound)
        b = jax.random.uniform(kb, (fan_out,), dtype, -bound, bound)
        params.append((w, b))
    return params


def prepare_params(params):
    """One-time: zero-pad every weight/bias so K and N are multiples of 128 and store the
    bias as [1, N] (lane-dense, no per-call reshape). Returns (padded_params, dims)."""
    dims = [params[0][0].shape[0]] + [w.shape[1] for (w, _) in params]
    padded = []
    for (w, b) in params:
        K, N = w.shape
        Kp, Np = _round_up(K, LANE), _round_up(N, LANE)
        wp = jnp.zeros((Kp, Np), w.dtype).at[:K, :N].set(w)
        bp = jnp.zeros((1, Np), b.dtype).at[0, :N].set(b)
        padded.append((wp, bp))
    return padded, dims


# ---------------------------------------------------------------------------
# Forward wrapper
# ---------------------------------------------------------------------------
def mlp_forward(padded_params, dims, x, *, m_tile=None):
    """Reproduces MLPModel.forward: returns (out, features).

    Zero-padding propagates zeros through ReLU layers, so padded columns contribute
    nothing; padding is sliced off before returning."""
    M, D0 = x.shape
    assert D0 == dims[0], f"expected input dim {dims[0]}, got {D0}"
    num_layers = len(padded_params)

    D0p = padded_params[0][0].shape[0]
    Dfeatp = padded_params[-1][0].shape[0]   # padded feature dim (= input of last layer)
    Doutp = padded_params[-1][1].shape[1]
    feat_dim, out_dim = dims[-2], dims[-1]

    # M tile: multiple of 8, capped at 256 rows so (tile x widest dim) x double-buffering
    # stays far under even v5e's 16 MiB scoped VMEM default when the MLP is scaled up.
    if m_tile is None:
        m_tile = min(_round_up(M, SUBLANE), 256)
    Mp = _round_up(M, m_tile)

    xp = jnp.zeros((Mp, D0p), x.dtype).at[:M, :D0].set(x)

    grid = (Mp // m_tile,)

    in_specs = [pl.BlockSpec((m_tile, D0p), lambda i: (i, 0))]
    flat_wb = []
    for (wp, bp) in padded_params:
        # Constant index_map -> weights/biases stay resident across all M tiles.
        in_specs.append(pl.BlockSpec(wp.shape, lambda i: (0, 0)))
        in_specs.append(pl.BlockSpec(bp.shape, lambda i: (0, 0)))
        flat_wb.extend([wp, bp])

    out_specs = [
        pl.BlockSpec((m_tile, Doutp), lambda i: (i, 0)),
        pl.BlockSpec((m_tile, Dfeatp), lambda i: (i, 0)),
    ]
    out_shape = [
        jax.ShapeDtypeStruct((Mp, Doutp), x.dtype),
        jax.ShapeDtypeStruct((Mp, Dfeatp), x.dtype),
    ]

    # Advisory cost hint so XLA schedules sensibly around the custom call.
    flops = 2 * Mp * sum(wp.shape[0] * wp.shape[1] for (wp, _) in padded_params)
    bytes_accessed = 4 * (
        Mp * D0p
        + sum(wp.size + bp.size for (wp, bp) in padded_params)
        + Mp * (Doutp + Dfeatp)
    )

    kernel = functools.partial(_mlp_fused_kernel, num_layers=num_layers)
    out_p, feat_p = pl.pallas_call(
        kernel,
        out_shape=out_shape,
        grid=grid,
        in_specs=in_specs,
        out_specs=out_specs,
        compiler_params=pltpu.CompilerParams(
            dimension_semantics=("parallel",),   # shards M tiles across TCs on v7x
        ),
        cost_estimate=pl.CostEstimate(
            flops=flops, transcendentals=0, bytes_accessed=bytes_accessed
        ),
    )(xp, *flat_wb)

    return out_p[:M, :out_dim], feat_p[:M, :feat_dim]


# ---------------------------------------------------------------------------
if __name__ == "__main__":
    # Small config consistent with the module (config.input_dim, config.hidden_dims,
    # config.out_dim, config.dropout).
    batch = 8
    input_dim = 32
    hidden_dims = [64, 32]
    out_dim = 16

    key = jax.random.PRNGKey(0)
    key, kx = jax.random.split(key)
    x = jax.random.normal(kx, (batch, input_dim), jnp.float32)

    params = init_mlp_params(key, input_dim, hidden_dims, out_dim)
    padded_params, dims = prepare_params(params)   # one-time padding (outside hot path)

    out, features = mlp_forward(padded_params, dims, x)
    jax.block_until_ready((out, features))

    # Sanity check against a plain-JAX reference.
    h_ref = x
    for (w, b) in params[:-1]:
        h_ref = jnp.maximum(h_ref @ w + b, 0.0)
    out_ref = h_ref @ params[-1][0] + params[-1][1]

    assert out.shape == (batch, out_dim)
    assert features.shape == (batch, hidden_dims[-1])
    assert jnp.allclose(out, out_ref, atol=1e-5, rtol=1e-5)
    assert jnp.allclose(features, h_ref, atol=1e-5, rtol=1e-5)

    print("KERNEL_OK")
</pallas_src>

<mosaic_0001>
module attributes {stable_mosaic.version = 11 : i64} {
  func.func @_mlp_fused_kernel(%arg0: i32, %arg1: memref<8x128xf32, #tpu.memory_space<vmem>>, %arg2: memref<128x128xf32, #tpu.memory_space<vmem>>, %arg3: memref<1x128xf32, #tpu.memory_space<vmem>>, %arg4: memref<128x128xf32, #tpu.memory_space<vmem>>, %arg5: memref<1x128xf32, #tpu.memory_space<vmem>>, %arg6: memref<128x128xf32, #tpu.memory_space<vmem>>, %arg7: memref<1x128xf32, #tpu.memory_space<vmem>>, %arg8: memref<8x128xf32, #tpu.memory_space<vmem>>, %arg9: memref<8x128xf32, #tpu.memory_space<vmem>>) attributes {dimension_semantics = [#tpu.dimension_semantics<parallel>], iteration_bounds = array<i64: 1>, scalar_prefetch = 0 : i64, scratch_operands = 0 : i64, tpu.core_type = #tpu.core_type<tc>, window_params = [{transform_indices = @transform_0, window_bounds = array<i64: 8, 128>}, {pipeline_mode = #tpu.pipeline_mode<synchronous>, transform_indices = @transform_1, window_bounds = array<i64: 128, 128>}, {pipeline_mode = #tpu.pipeline_mode<synchronous>, transform_indices = @transform_2, window_bounds = array<i64: 1, 128>}, {pipeline_mode = #tpu.pipeline_mode<synchronous>, transform_indices = @transform_3, window_bounds = array<i64: 128, 128>}, {pipeline_mode = #tpu.pipeline_mode<synchronous>, transform_indices = @transform_4, window_bounds = array<i64: 1, 128>}, {pipeline_mode = #tpu.pipeline_mode<synchronous>, transform_indices = @transform_5, window_bounds = array<i64: 128, 128>}, {pipeline_mode = #tpu.pipeline_mode<synchronous>, transform_indices = @transform_6, window_bounds = array<i64: 1, 128>}, {transform_indices = @transform_7, window_bounds = array<i64: 8, 128>}, {transform_indices = @transform_8, window_bounds = array<i64: 8, 128>}]} {
    %c0 = arith.constant 0 : index
    %c0_0 = arith.constant 0 : index
    %0 = vector.load %arg1[%c0, %c0_0] : memref<8x128xf32, #tpu.memory_space<vmem>>, vector<8x128xf32>
    %c0_1 = arith.constant 0 : index
    %c0_2 = arith.constant 0 : index
    %1 = vector.load %arg2[%c0_1, %c0_2] : memref<128x128xf32, #tpu.memory_space<vmem>>, vector<128x128xf32>
    %c0_3 = arith.constant 0 : index
    %c0_4 = arith.constant 0 : index
    %2 = vector.load %arg3[%c0_3, %c0_4] : memref<1x128xf32, #tpu.memory_space<vmem>>, vector<1x128xf32>
    %cst = arith.constant dense<0.000000e+00> : vector<8x128xf32>
    %3 = tpu.matmul %0, %1, %cst {dimension_numbers = #tpu.dot_dimension_numbers<[1], [0], [0], [1], [0, 0, 1, 1], [], []>} : vector<8x128xf32>, vector<128x128xf32>, vector<8x128xf32> -> vector<8x128xf32>
    %4 = vector.broadcast %2 : vector<1x128xf32> to vector<8x128xf32>
    %5 = arith.addf %3, %4 : vector<8x128xf32>
    %cst_5 = arith.constant 0.000000e+00 : f32
    %6 = vector.broadcast %cst_5 : f32 to vector<8x128xf32>
    %7 = arith.maximumf %5, %6 : vector<8x128xf32>
    %c0_6 = arith.constant 0 : index
    %c0_7 = arith.constant 0 : index
    %8 = vector.load %arg4[%c0_6, %c0_7] : memref<128x128xf32, #tpu.memory_space<vmem>>, vector<128x128xf32>
    %c0_8 = arith.constant 0 : index
    %c0_9 = arith.constant 0 : index
    %9 = vector.load %arg5[%c0_8, %c0_9] : memref<1x128xf32, #tpu.memory_space<vmem>>, vector<1x128xf32>
    %cst_10 = arith.constant dense<0.000000e+00> : vector<8x128xf32>
    %10 = tpu.matmul %7, %8, %cst_10 {dimension_numbers = #tpu.dot_dimension_numbers<[1], [0], [0], [1], [0, 0, 1, 1], [], []>} : vector<8x128xf32>, vector<128x128xf32>, vector<8x128xf32> -> vector<8x128xf32>
    %11 = vector.broadcast %9 : vector<1x128xf32> to vector<8x128xf32>
    %12 = arith.addf %10, %11 : vector<8x128xf32>
    %cst_11 = arith.constant 0.000000e+00 : f32
    %13 = vector.broadcast %cst_11 : f32 to vector<8x128xf32>
    %14 = arith.maximumf %12, %13 : vector<8x128xf32>
    %c0_12 = arith.constant 0 : index
    %c0_13 = arith.constant 0 : index
    %15 = vector.load %arg9[%c0_12, %c0_13] : memref<8x128xf32, #tpu.memory_space<vmem>>, vector<8x128xf32>
    tpu.vector_store %arg9[%c0_12, %c0_13], %14 {strides = array<i32>} : memref<8x128xf32, #tpu.memory_space<vmem>>, vector<8x128xf32>,
    %c0_14 = arith.constant 0 : index
    %c0_15 = arith.constant 0 : index
    %16 = vector.load %arg6[%c0_14, %c0_15] : memref<128x128xf32, #tpu.memory_space<vmem>>, vector<128x128xf32>
    %c0_16 = arith.constant 0 : index
    %c0_17 = arith.constant 0 : index
    %17 = vector.load %arg7[%c0_16, %c0_17] : memref<1x128xf32, #tpu.memory_space<vmem>>, vector<1x128xf32>
    %cst_18 = arith.constant dense<0.000000e+00> : vector<8x128xf32>
    %18 = tpu.matmul %14, %16, %cst_18 {dimension_numbers = #tpu.dot_dimension_numbers<[1], [0], [0], [1], [0, 0, 1, 1], [], []>} : vector<8x128xf32>, vector<128x128xf32>, vector<8x128xf32> -> vector<8x128xf32>
    %19 = vector.broadcast %17 : vector<1x128xf32> to vector<8x128xf32>
    %20 = arith.addf %18, %19 : vector<8x128xf32>
    %c0_19 = arith.constant 0 : index
    %c0_20 = arith.constant 0 : index
    %21 = vector.load %arg8[%c0_19, %c0_20] : memref<8x128xf32, #tpu.memory_space<vmem>>, vector<8x128xf32>
    tpu.vector_store %arg8[%c0_19, %c0_20], %20 {strides = array<i32>} : memref<8x128xf32, #tpu.memory_space<vmem>>, vector<8x128xf32>,
    return
  }
  func.func @transform_0(%arg0: i32) -> (i32, i32) {
    %c0_i32 = arith.constant 0 : i32
    %c0_i32_0 = arith.constant 0 : i32
    return %arg0, %c0_i32 : i32, i32
  }
  func.func @transform_1(%arg0: i32) -> (i32, i32) {
    %c0_i32 = arith.constant 0 : i32
    %c0_i32_0 = arith.constant 0 : i32
    %c0_i32_1 = arith.constant 0 : i32
    return %c0_i32, %c0_i32_0 : i32, i32
  }
  func.func @transform_2(%arg0: i32) -> (i32, i32) {
    %c0_i32 = arith.constant 0 : i32
    %c0_i32_0 = arith.constant 0 : i32
    %c0_i32_1 = arith.constant 0 : i32
    return %c0_i32, %c0_i32_0 : i32, i32
  }
  func.func @transform_3(%arg0: i32) -> (i32, i32) {
    %c0_i32 = arith.constant 0 : i32
    %c0_i32_0 = arith.constant 0 : i32
    %c0_i32_1 = arith.constant 0 : i32
    return %c0_i32, %c0_i32_0 : i32, i32
  }
  func.func @transform_4(%arg0: i32) -> (i32, i32) {
    %c0_i32 = arith.constant 0 : i32
    %c0_i32_0 = arith.constant 0 : i32
    %c0_i32_1 = arith.constant 0 : i32
    return %c0_i32, %c0_i32_0 : i32, i32
  }
  func.func @transform_5(%arg0: i32) -> (i32, i32) {
    %c0_i32 = arith.constant 0 : i32
    %c0_i32_0 = arith.constant 0 : i32
    %c0_i32_1 = arith.constant 0 : i32
    return %c0_i32, %c0_i32_0 : i32, i32
  }
  func.func @transform_6(%arg0: i32) -> (i32, i32) {
    %c0_i32 = arith.constant 0 : i32
    %c0_i32_0 = arith.constant 0 : i32
    %c0_i32_1 = arith.constant 0 : i32
    return %c0_i32, %c0_i32_0 : i32, i32
  }
  func.func @transform_7(%arg0: i32) -> (i32, i32) {
    %c0_i32 = arith.constant 0 : i32
    %c0_i32_0 = arith.constant 0 : i32
    return %arg0, %c0_i32 : i32, i32
  }
  func.func @transform_8(%arg0: i32) -> (i32, i32) {
    %c0_i32 = arith.constant 0 : i32
    %c0_i32_0 = arith.constant 0 : i32
    return %arg0, %c0_i32 : i32, i32
  }
}

</mosaic_0001>

<bundles_post_ra>
// kernel: tpu_custom_call.1
= control target key start
LH: loop header
LB: loop body
LE: loop exit
PB: predicated region body
PF: predicated region fallthrough
CT: control target
= control target key end

     0   :  { %14 = vsyncpa [#allocation3], 0  ;;  %s842_s0 = inlined_call_operand.hbm [shape: f32[8,128], index: 0, kind: input, shape index: {}]   ;;  %s843_s1 = inlined_call_operand.hbm [shape: f32[128,128], index: 1, kind: input, shape index: {}]   ;;  %s844_s2 = inlined_call_operand.vmem [shape: f32[1,128], index: 2, kind: input, shape index: {}]   ;;  %s845_s3 = inlined_call_operand.hbm [shape: f32[128,128], index: 3, kind: input, shape index: {}]   ;;  %s846_s4 = inlined_call_operand.vmem [shape: f32[1,128], index: 4, kind: input, shape index: {}]   ;;  %s847_s5 = inlined_call_operand.hbm [shape: f32[128,128], index: 5, kind: input, shape index: {}]   ;;  %s848_s6 = inlined_call_operand.vmem [shape: f32[1,128], index: 6, kind: input, shape index: {}]   ;;  %s849_s7 = inlined_call_operand.hbm [shape: f32[8,128], index: 7, kind: output, shape index: {0}]   ;;  %s850_s8 = inlined_call_operand.hbm [shape: f32[8,128], index: 8, kind: output, shape index: {1}]  }
   0x1   :  { %15 = vsyncpa [#allocation6], 0 }
   0x2   :  { %16 = vsyncpa [#allocation9], 0 }
   0x3   :  { %17 = vsyncpa [#allocation4], 0 }
   0x4   :  { %18 = vsyncpa [#allocation12], 0  ;;  %s697_s27 = smov [#allocation5]  }
   0x5   :  { %s34_s28 = sshll.u32 %s697_s27, 4  ;;  %s35_s28 = int_to_ptr.vmem [resolvable:$true] %s34_s28 }
   0x6   :  { %s575_s29 = scalar_lea.vmem %s35_s28, 2048  ;;  %p580_p1 = scmp.lt.s32.totalorder %s35_s28, %s35_s28 }
   0x7   :  { %p576_p0 = scmp.ne.s32.totalorder %s35_s28, %s575_s29  ;;  %p581_p2 = scmp.lt.s32.totalorder %s575_s29, %s575_s29 }
   0x9   :  { %p582_p3 = por %p581_p2, %p580_p1 }
   0xb   :  { %p583_p4 = pnand %p582_p3, %p576_p0 }
   0xd   :  { %586 = shalt.err (!%p583_p4)
}
   0xe   :  { %s698_s30 = smov 128   ;;  %s699_s9 = smov 8  }
   0xf   :  { %40 = dma.hbm_to_vmem [thread:$0]  %s843_s1, 2048, %s35_s28, [#allocation6], %s698_s30, %s698_s30, %s699_s9  }
  0x10   :  { %s700_s12 = smov [#allocation2]   ;;  %s701_s14 = smov [#allocation7]  }
  0x11   :  { %s25_s13 = sshll.u32 %s700_s12, 4  ;;  %s48_s15 = sshll.u32 %s701_s14, 4  ;;  %s26_s13 = int_to_ptr.vmem [resolvable:$true] %s25_s13  ;;  %s49_s15 = int_to_ptr.vmem [resolvable:$true] %s48_s15 }
  0x12   :  { %s595_s16 = scalar_lea.vmem %s26_s13, 128  ;;  %p600_p6 = scmp.lt.s32.totalorder %s26_s13, %s26_s13 }
  0x13   :  { %p596_p5 = scmp.ne.s32.totalorder %s26_s13, %s595_s16  ;;  %p601_p7 = scmp.lt.s32.totalorder %s595_s16, %s595_s16 }
  0x15   :  { %p602_p8 = por %p601_p7, %p600_p6 }
  0x17   :  { %p603_p9 = pnand %p602_p8, %p596_p5 }
  0x19   :  { %606 = shalt.err (!%p603_p9)
}
  0x1a   :  { %28 = dma.hbm_to_vmem [thread:$0]  %s842_s0, 128, %s26_s13, [#allocation3]  }
  0x1b   :  { %s615_s19 = scalar_lea.vmem %s49_s15, 2048  ;;  %p620_p11 = scmp.lt.s32.totalorder %s49_s15, %s49_s15 }
  0x1c   :  { %p616_p10 = scmp.ne.s32.totalorder %s49_s15, %s615_s19  ;;  %p621_p12 = scmp.lt.s32.totalorder %s615_s19, %s615_s19 }
  0x1e   :  { %p622_p13 = por %p621_p12, %p620_p11 }
  0x20   :  { %p623_p0 = pnand %p622_p13, %p616_p10 }
  0x22   :  { %626 = shalt.err (!%p623_p0)
}
  0x23   :  { %54 = dma.hbm_to_vmem [thread:$0]  %s845_s3, 2048, %s49_s15, [#allocation6], %s698_s30, %s698_s30, %s699_s9  }
  0x24   :  { %s702_s21 = smov [#allocation8]  }
  0x25   :  { %s62_s22 = sshll.u32 %s702_s21, 4  ;;  %s63_s22 = int_to_ptr.vmem [resolvable:$true] %s62_s22 }
  0x26   :  { %s635_s23 = scalar_lea.vmem %s63_s22, 2048  ;;  %p640_p2 = scmp.lt.s32.totalorder %s63_s22, %s63_s22 }
  0x27   :  { %p636_p1 = scmp.ne.s32.totalorder %s63_s22, %s635_s23  ;;  %p641_p3 = scmp.lt.s32.totalorder %s635_s23, %s635_s23 }
  0x29   :  { %p642_p4 = por %p641_p3, %p640_p2 }
  0x2b   :  { %p643_p5 = pnand %p642_p4, %p636_p1 }
  0x2d   :  { %646 = shalt.err (!%p643_p5)
}
  0x2e   :  { %68 = dma.hbm_to_vmem [thread:$0]  %s847_s5, 2048, %s63_s22, [#allocation9], %s698_s30, %s698_s30, %s699_s9  }
  0x2f   :  { %687 = dma.done.wait [#allocation3], 128  }
  0x30   :  { %688 = vsyncadd [#allocation3], 4294967168 }
  0x31   :  { %689 = dma.done.wait [#allocation6], 4096  }
  0x32   :  { %690 = vsyncadd [#allocation6], 4294963200 }
  0x33   :  { %691 = dma.done.wait [#allocation9], 2048  }
  0x34   :  { %692 = vsyncadd [#allocation9], 4294965248  ;;  %v703_v0 = vmov 0.0   ;;  %vm704_vm0 = vmmov 0   ;;  %v99_v1 = vld [vmem:[#allocation5 + $0x78] sm:$0xff]  ;;  %v98_v2 = vld [vmem:[#allocation5 + $0x70] sm:$0xff] }
  0x35   :  { %452 = vmatprep.subr.mxu0 %v703_v0  ;;  %484 = vmatprep.mubr.msk.f32.mxu0 %vm704_vm0, %v703_v0  ;;  %v97_v3 = vld [vmem:[#allocation5 + $0x68] sm:$0xff]  ;;  %v96_v4 = vld [vmem:[#allocation5 + $0x60] sm:$0xff]  ;;  %v193_v5 = vld [vmem:[#allocation7 + $0x78] sm:$0xff] }
  0x36   :  { %487 = vmatprep.subr.mxu1 %v703_v0  ;;  %519 = vmatprep.mubr.msk.f32.mxu1 %vm704_vm0, %v703_v0  ;;  %v95_v6 = vld [vmem:[#allocation5 + $0x58] sm:$0xff]  ;;  %v192_v7 = vld [vmem:[#allocation7 + $0x70] sm:$0xff]  ;;  %v191_v8 = vld [vmem:[#allocation7 + $0x68] sm:$0xff] }
  0x37   :  { %453 = vmatpush3.msra.mxu0 %v99_v1  ;;  %488 = vmatpush3.msra.mxu1 %v193_v5  ;;  %v94_v9 = vld [vmem:[#allocation5 + $0x50] sm:$0xff]  ;;  %v190_v10 = vld [vmem:[#allocation7 + $0x60] sm:$0xff]  ;;  %v93_v11 = vld [vmem:[#allocation5 + $0x48] sm:$0xff] }
  0x38   :  { %454 = vmatprep.subr.mxu0 %v703_v0  ;;  %489 = vmatprep.subr.mxu1 %v703_v0  ;;  %v189_v12 = vld [vmem:[#allocation7 + $0x58] sm:$0xff]  ;;  %v92_v13 = vld [vmem:[#allocation5 + $0x40] sm:$0xff]  ;;  %v188_v14 = vld [vmem:[#allocation7 + $0x50] sm:$0xff] }
  0x39   :  { %455 = vmatpush3.msra.mxu0 %v98_v2  ;;  %490 = vmatpush3.msra.mxu1 %v192_v7  ;;  %v91_v15 = vld [vmem:[#allocation5 + $0x38] sm:$0xff]  ;;  %v187_v16 = vld [vmem:[#allocation7 + $0x48] sm:$0xff]  ;;  %v90_v17 = vld [vmem:[#allocation5 + $0x30] sm:$0xff] }
  0x3a   :  { %456 = vmatprep.subr.mxu0 %v703_v0  ;;  %491 = vmatprep.subr.mxu1 %v703_v0  ;;  %v186_v18 = vld [vmem:[#allocation7 + $0x40] sm:$0xff]  ;;  %v89_v19 = vld [vmem:[#allocation5 + $0x28] sm:$0xff]  ;;  %v185_v20 = vld [vmem:[#allocation7 + $0x38] sm:$0xff] }
  0x3b   :  { %457 = vmatpush3.msra.mxu0 %v97_v3  ;;  %492 = vmatpush3.msra.mxu1 %v191_v8  ;;  %v88_v21 = vld [vmem:[#allocation5 + $0x20] sm:$0xff]  ;;  %v184_v22 = vld [vmem:[#allocation7 + $0x30] sm:$0xff]  ;;  %v87_v23 = vld [vmem:[#allocation5 + $0x18] sm:$0xff] }
  0x3c   :  { %458 = vmatprep.subr.mxu0 %v703_v0  ;;  %493 = vmatprep.subr.mxu1 %v703_v0  ;;  %v183_v24 = vld [vmem:[#allocation7 + $0x28] sm:$0xff]  ;;  %v86_v25 = vld [vmem:[#allocation5 + $0x10] sm:$0xff]  ;;  %v182_v26 = vld [vmem:[#allocation7 + $0x20] sm:$0xff] }
  0x3d   :  { %459 = vmatpush3.msra.mxu0 %v96_v4  ;;  %494 = vmatpush3.msra.mxu1 %v190_v10  ;;  %v85_v27 = vld [vmem:[#allocation5 + $0x8] sm:$0xff]  ;;  %v181_v28 = vld [vmem:[#allocation7 + $0x18] sm:$0xff]  ;;  %v84_v29 = vld [vmem:[#allocation5] sm:$0xff] }
  0x3e   :  { %460 = vmatprep.subr.mxu0 %v703_v0  ;;  %495 = vmatprep.subr.mxu1 %v703_v0  ;;  %v83_v30 = vld [vmem:[#allocation2] sm:$0xff]  ;;  %v180_v31 = vld [vmem:[#allocation7 + $0x10] sm:$0xff]  ;;  %v179_v32 = vld [vmem:[#allocation7 + $0x8] sm:$0xff] }
  0x3f   :  { %461 = vmatpush3.msra.mxu0 %v95_v6  ;;  %496 = vmatpush3.msra.mxu1 %v189_v12  ;;  %v178_v33 = vld [vmem:[#allocation7] sm:$0xff]  ;;  %v288_v34 = vld [vmem:[#allocation8 + $0x78] sm:$0xff]  ;;  %v287_v35 = vld [vmem:[#allocation8 + $0x70] sm:$0xff] }
  0x40   :  { %462 = vmatprep.subr.mxu0 %v703_v0  ;;  %497 = vmatprep.subr.mxu1 %v703_v0  ;;  %v286_v36 = vld [vmem:[#allocation8 + $0x68] sm:$0xff]  ;;  %v285_v37 = vld [vmem:[#allocation8 + $0x60] sm:$0xff]  ;;  %v284_v38 = vld [vmem:[#allocation8 + $0x58] sm:$0xff] }
  0x41   :  { %463 = vmatpush3.msra.mxu0 %v94_v9  ;;  %498 = vmatpush3.msra.mxu1 %v188_v14  ;;  %v283_v39 = vld [vmem:[#allocation8 + $0x50] sm:$0xff]  ;;  %v282_v40 = vld [vmem:[#allocation8 + $0x48] sm:$0xff]  ;;  %v281_v41 = vld [vmem:[#allocation8 + $0x40] sm:$0xff] }
  0x42   :  { %464 = vmatprep.subr.mxu0 %v703_v0  ;;  %499 = vmatprep.subr.mxu1 %v703_v0  ;;  %v280_v42 = vld [vmem:[#allocation8 + $0x38] sm:$0xff]  ;;  %v279_v43 = vld [vmem:[#allocation8 + $0x30] sm:$0xff]  ;;  %v278_v44 = vld [vmem:[#allocation8 + $0x28] sm:$0xff] }
  0x43   :  { %465 = vmatpush3.msra.mxu0 %v93_v11  ;;  %500 = vmatpush3.msra.mxu1 %v187_v16  ;;  %v277_v45 = vld [vmem:[#allocation8 + $0x20] sm:$0xff]  ;;  %v276_v46 = vld [vmem:[#allocation8 + $0x18] sm:$0xff]  ;;  %v275_v52 = vld [vmem:[#allocation8 + $0x10] sm:$0xff] }
  0x44   :  { %466 = vmatprep.subr.mxu0 %v703_v0  ;;  %501 = vmatprep.subr.mxu1 %v703_v0  ;;  %v398_v47 = vld [vmem:[%s844_s2] ss:$0 sm:$0xff]  ;;  %v274_v53 = vld [vmem:[#allocation8 + $0x8] sm:$0xff]  ;;  %v273_v54 = vld [vmem:[#allocation8] sm:$0xff]  ;;  %s705_s2 = smov [#allocation11]  }
  0x45   :  { %467 = vmatpush3.msra.mxu0 %v92_v13  ;;  %502 = vmatpush3.msra.mxu1 %v186_v18  ;;  %v399_v55 = vld [vmem:[%s846_s4] ss:$0 sm:$0xff]  ;;  %s383_s27 = sshll.u32 %s705_s2, 4  ;;  %s384_s27 = int_to_ptr.vmem [resolvable:$true] %s383_s27 }
  0x46   :  { %468 = vmatprep.subr.mxu0 %v703_v0  ;;  %503 = vmatprep.subr.mxu1 %v703_v0  ;;  %s647_s28 = scalar_lea.vmem %s384_s27, 128  ;;  %p652_p7 = scmp.lt.s32.totalorder %s384_s27, %s384_s27 }
  0x47   :  { %469 = vmatpush3.msra.mxu0 %v91_v15  ;;  %504 = vmatpush3.msra.mxu1 %v185_v20  ;;  %p648_p6 = scmp.ne.s32.totalorder %s384_s27, %s647_s28  ;;  %p653_p8 = scmp.lt.s32.totalorder %s647_s28, %s647_s28 }
  0x48   :  { %470 = vmatprep.subr.mxu0 %v703_v0  ;;  %505 = vmatprep.subr.mxu1 %v703_v0 }
  0x49   :  { %471 = vmatpush3.msra.mxu0 %v90_v17  ;;  %506 = vmatpush3.msra.mxu1 %v184_v22  ;;  %p654_p9 = por %p653_p8, %p652_p7 }
  0x4a   :  { %472 = vmatprep.subr.mxu0 %v703_v0  ;;  %507 = vmatprep.subr.mxu1 %v703_v0 }
  0x4b   :  { %473 = vmatpush3.msra.mxu0 %v89_v19  ;;  %508 = vmatpush3.msra.mxu1 %v183_v24  ;;  %p655_p10 = pnand %p654_p9, %p648_p6 }
  0x4c   :  { %474 = vmatprep.subr.mxu0 %v703_v0  ;;  %509 = vmatprep.subr.mxu1 %v703_v0 }
  0x4d   :  { %475 = vmatpush3.msra.mxu0 %v88_v21  ;;  %510 = vmatpush3.msra.mxu1 %v182_v26 }
  0x4e   :  { %476 = vmatprep.subr.mxu0 %v703_v0  ;;  %511 = vmatprep.subr.mxu1 %v703_v0 }
  0x4f   :  { %477 = vmatpush3.msra.mxu0 %v87_v23  ;;  %512 = vmatpush3.msra.mxu1 %v181_v28 }
  0x50   :  { %478 = vmatprep.subr.mxu0 %v703_v0  ;;  %513 = vmatprep.subr.mxu1 %v703_v0 }
  0x51   :  { %479 = vmatpush3.msra.mxu0 %v86_v25  ;;  %514 = vmatpush3.msra.mxu1 %v180_v31 }
  0x52   :  { %480 = vmatprep.subr.mxu0 %v703_v0  ;;  %515 = vmatprep.subr.mxu1 %v703_v0 }
  0x53   :  { %481 = vmatpush3.msra.mxu0 %v85_v27  ;;  %516 = vmatpush3.msra.mxu1 %v179_v32 }
  0x54   :  { %482 = vmatprep.subr.mxu0 %v703_v0  ;;  %517 = vmatprep.subr.mxu1 %v703_v0 }
  0x55   :  { %483 = vmatpush3.msra.mxu0 %v84_v29  ;;  %518 = vmatpush3.msra.mxu1 %v178_v33 }
  0x56   :  { %485 = vmatmul.mubr.f32.vlgmr.msra.gmra.mxu0 %v83_v30  ;;  %522 = vmatprep.subr.mxu0 %v703_v0 }
  0x57   :  { %554 = vmatprep.mubr.msk.f32.mxu0 %vm704_vm0, %v703_v0  ;;  %523 = vmatpush3.msra.mxu0 %v288_v34 }
  0x58   :  { %524 = vmatprep.subr.mxu0 %v703_v0 }
  0x59   :  { %525 = vmatpush3.msra.mxu0 %v287_v35 }
  0x5a   :  { %526 = vmatprep.subr.mxu0 %v703_v0 }
  0x5b   :  { %527 = vmatpush3.msra.mxu0 %v286_v36 }
  0x5c   :  { %528 = vmatprep.subr.mxu0 %v703_v0 }
  0x5d   :  { %529 = vmatpush3.msra.mxu0 %v285_v37 }
  0x5e   :  { %530 = vmatprep.subr.mxu0 %v703_v0 }
  0x5f   :  { %531 = vmatpush3.msra.mxu0 %v284_v38 }
  0x60   :  { %532 = vmatprep.subr.mxu0 %v703_v0 }
  0x61   :  { %533 = vmatpush3.msra.mxu0 %v283_v39 }
  0x62   :  { %534 = vmatprep.subr.mxu0 %v703_v0 }
  0x63   :  { %535 = vmatpush3.msra.mxu0 %v282_v40 }
  0x64   :  { %536 = vmatprep.subr.mxu0 %v703_v0 }
  0x65   :  { %537 = vmatpush3.msra.mxu0 %v281_v41 }
  0x66   :  { %538 = vmatprep.subr.mxu0 %v703_v0 }
  0x67   :  { %539 = vmatpush3.msra.mxu0 %v280_v42 }
  0x68   :  { %540 = vmatprep.subr.mxu0 %v703_v0 }
  0x69   :  { %541 = vmatpush3.msra.mxu0 %v279_v43 }
  0x6a   :  { %542 = vmatprep.subr.mxu0 %v703_v0 }
  0x6b   :  { %543 = vmatpush3.msra.mxu0 %v278_v44 }
  0x6c   :  { %544 = vmatprep.subr.mxu0 %v703_v0 }
  0x6d   :  { %545 = vmatpush3.msra.mxu0 %v277_v45 }
  0x6e   :  { %546 = vmatprep.subr.mxu0 %v703_v0 }
  0x6f   :  { %547 = vmatpush3.msra.mxu0 %v276_v46 }
  0x70   :  { %548 = vmatprep.subr.mxu0 %v703_v0 }
  0x71   :  { %549 = vmatpush3.msra.mxu0 %v275_v52 }
  0x72   :  { %550 = vmatprep.subr.mxu0 %v703_v0 }
  0x73   :  { %551 = vmatpush3.msra.mxu0 %v274_v53 }
  0x74   :  { %552 = vmatprep.subr.mxu0 %v703_v0 }
  0x75   :  { %553 = vmatpush3.msra.mxu0 %v273_v54 }
 0x116   :  { %v173_v48 = vpop.f32.mrf.mxu0 }
 0x117   :  { %v174_v49 = vadd.f32 %v398_v47, %v173_v48 }
 0x118   :  { %v486_v50 = vpop.f32.mrf.mxu0 }
 0x119   :  { %v177_v51 = vmax.f32 %v174_v49, 0.0 }
 0x11b   :  { %520 = vmatmul.mubr.f32.vlgmr.msra.gmra.mxu1 %v177_v51 }
 0x1db   :  { %v267_v56 = vpop.f32.mrf.mxu1 }
 0x1dc   :  { %v268_v57 = vadd.f32 %v399_v55, %v267_v56 }
 0x1dd   :  { %v521_v58 = vpop.f32.mrf.mxu1 }
 0x1de   :  { %v271_v59 = vmax.f32 %v268_v57, 0.0 }
 0x1e0   :  { %272 = vst [vmem:[#allocation11] sm:$0xff] %v271_v59  ;;  %555 = vmatmul.mubr.f32.vlgmr.msra.gmra.mxu0 %v271_v59 }
 0x1e1   :  { %658 = shalt.err (!%p655_p10)
}
 0x1e2   :  { %386 = dma.vmem_to_hbm [thread:$0]  %s384_s27, 128, %s850_s8, [#allocation12]   ;;  %v400_v60 = vld [vmem:[%s848_s6] ss:$0 sm:$0xff] }
 0x1e3   :  { %s706_s10 = smov [#allocation10]  }
 0x1e4   :  { %s373_s11 = sshll.u32 %s706_s10, 4  ;;  %s374_s11 = int_to_ptr.vmem [resolvable:$true] %s373_s11 }
 0x1e5   :  { %s667_s12 = scalar_lea.vmem %s374_s11, 128  ;;  %p672_p12 = scmp.lt.s32.totalorder %s374_s11, %s374_s11 }
 0x1e6   :  { %p668_p11 = scmp.ne.s32.totalorder %s374_s11, %s667_s12  ;;  %p673_p13 = scmp.lt.s32.totalorder %s667_s12, %s667_s12 }
 0x1e8   :  { %p674_p0 = por %p673_p13, %p672_p12 }
 0x1ea   :  { %p675_p1 = pnand %p674_p0, %p668_p11 }
 0x2a0   :  { %v362_v61 = vpop.f32.mrf.mxu0 }
 0x2a1   :  { %v363_v62 = vadd.f32 %v400_v60, %v362_v61 }
 0x2a2   :  { %v556_v63 = vpop.f32.mrf.mxu0 }
 0x2a3   :  { %366 = vst [vmem:[#allocation10] sm:$0xff] %v363_v62 }
 0x2a4   :  { %678 = shalt.err (!%p675_p1)
}
 0x2a5   :  { %376 = dma.vmem_to_hbm [thread:$0]  %s374_s11, 128, %s849_s7, [#allocation4]  }
 0x2a6   :  { %693 = dma.done.wait [#allocation4], 128  }
 0x2a7   :  { %694 = vsyncadd [#allocation4], 4294967168 }
 0x2a8   :  { %695 = dma.done.wait [#allocation12], 128  }
 0x2a9   :  { %696 = vsyncadd [#allocation12], 4294967168 }
 0x2aa   :  { %393 = vsyncpa [#allocation3], 1 }
 0x2ab   :  { %394 = vsyncpa [#allocation6], 1 }
 0x2ac   :  { %395 = vsyncpa [#allocation9], 1 }
 0x2ad   :  { %396 = vsyncpa [#allocation4], 1 }
 0x2ae   :  { %397 = vsyncpa [#allocation12], 1 }

</bundles_post_ra>
